<compile_context>
chip_gen: v7x
topology: tpu7x:2x2x1
jax: 0.10.0
libtpu: 0.0.40
codegen_flags: <defaults>
</compile_context>

<pallas_src>
import functools

import jax
import jax.numpy as jnp
from jax.experimental import pallas as pl
from jax.experimental.pallas import tpu as pltpu


def _soft_xent_kernel(x_ref, y_ref, loss_ref, *, block_rows, valid_rows):
    # x_ref, y_ref: (tb, C) tile of logits / soft targets (any float dtype).
    # loss_ref:     (tb, 1) per-row loss (f32).
    x = x_ref[...].astype(jnp.float32)
    y = y_ref[...].astype(jnp.float32)

    # Numerically stable, fully folded form:
    #   logsumexp = max(x) + log(sum(exp(x - max(x))))
    #   loss_i    = logsumexp_i * sum_j y_ij - sum_j y_ij * x_ij
    m = jnp.max(x, axis=-1, keepdims=True)
    lse = m + jnp.log(jnp.sum(jnp.exp(x - m), axis=-1, keepdims=True))
    sum_y = jnp.sum(y, axis=-1, keepdims=True)
    sum_yx = jnp.sum(y * x, axis=-1, keepdims=True)
    loss = lse * sum_y - sum_yx

    # Mask rows past the true batch size (tail block of a ragged grid). The
    # garbage contents of out-of-range input rows never contaminate valid rows
    # (all reductions are along the class axis only).
    row = (pl.program_id(0) * block_rows
           + jax.lax.broadcasted_iota(jnp.int32, loss.shape, 0))
    loss_ref[...] = jnp.where(row < valid_rows, loss, 0.0)


def _round_up(v, m):
    return ((v + m - 1) // m) * m


def _chip_vmem_params():
    """(default working-set budget, vmem_limit cap) tuned per chip generation."""
    try:
        cap = int(pltpu.get_tpu_info().vmem_capacity_bytes)
    except Exception:
        cap = 64 << 20  # conservative fallback (v7x-class)
    if cap <= (64 << 20):          # v7x: 64 MiB physical VMEM per TensorCore
        return 12 << 20, 48 << 20
    return 24 << 20, 56 << 20      # v5e / v6e: 128 MiB physical VMEM


def _bytes_per_row(C, itemsize):
    """Per-row VMEM footprint with lane padding and in-kernel f32 temporaries."""
    c_pad = _round_up(C, 128)
    # 2 inputs x 2 pipeline buffers of the streamed dtype
    # + ~4 full-width f32 intermediates (x/y casts, exp(x-m), y*x)
    # + double-buffered (tb, 1) f32 output tile.
    return 2 * 2 * c_pad * itemsize + 4 * c_pad * 4 + 2 * 4


def _choose_block_rows(B, C, itemsize, max_block_rows, vmem_budget_bytes):
    """Largest row tile that fits the VMEM budget, with >=2 grid blocks if B>8."""
    if B <= 8:
        # Single block covering all rows: block dim equals full array dim, so
        # the (8, 128) divisibility constraint does not apply.
        return B

    tb = int(vmem_budget_bytes // max(_bytes_per_row(C, itemsize), 1))
    tb = (tb // 32) * 32           # sublane-packing friendly (bf16/int8 safe)
    if tb < 32:
        tb = 8                     # minimal legal tile

    # Keep >= 2 (typically >= 4) grid blocks so a 2-TensorCore chip (v7x) can
    # shard the "parallel" grid axis; negligible overhead on 1-TC chips.
    split_target = _round_up(pl.cdiv(B, 4), 8)

    tb = min(tb, split_target, int(max_block_rows))
    return max(tb, 8)


def soft_target_cross_entropy(
    x,
    y,
    reduction="mean",
    max_block_rows=1024,
    vmem_budget_bytes=None,
):
    """x: (B, C) logits, y: (B, C) soft targets. Class axis last (lane dim)."""
    B, C = x.shape
    assert y.shape == (B, C)

    itemsize = max(jnp.dtype(x.dtype).itemsize, jnp.dtype(y.dtype).itemsize)
    default_budget, limit_cap = _chip_vmem_params()
    if vmem_budget_bytes is None:
        vmem_budget_bytes = default_budget

    max_block_rows = max(8, (int(max_block_rows) // 8) * 8)
    tb = _choose_block_rows(B, C, itemsize, max_block_rows, vmem_budget_bytes)
    grid = pl.cdiv(B, tb)

    # Explicit scoped-VMEM limit: real working set (lane-padded, incl. f32
    # temporaries) + headroom, capped per chip (48 MiB on v7x's 64 MiB VMEM).
    working_set = tb * _bytes_per_row(C, itemsize)
    vmem_limit = int(min(max(working_set * 5 // 4 + (2 << 20), 24 << 20),
                         limit_cap))

    kernel = functools.partial(_soft_xent_kernel, block_rows=tb, valid_rows=B)

    per_row = pl.pallas_call(
        kernel,
        out_shape=jax.ShapeDtypeStruct((B, 1), jnp.float32),
        grid_spec=pltpu.PrefetchScalarGridSpec(
            num_scalar_prefetch=0,
            grid=(grid,),
            in_specs=[
                pl.BlockSpec((tb, C), lambda i: (i, 0)),
                pl.BlockSpec((tb, C), lambda i: (i, 0)),
            ],
            out_specs=pl.BlockSpec((tb, 1), lambda i: (i, 0)),
        ),
        compiler_params=pltpu.CompilerParams(
            dimension_semantics=("parallel",),
            vmem_limit_bytes=vmem_limit,
        ),
    )(x, y)

    loss = per_row[:, 0]
    if reduction == "mean":
        # Always return f32 for 'mean' (f32 accumulation, matching the
        # PyTorch reference instead of truncating to bf16).
        return jnp.mean(loss)
    elif reduction == "none":
        return loss.astype(x.dtype)
    else:
        raise NotImplementedError


if __name__ == "__main__":
    key = jax.random.PRNGKey(0)
    kx, ky = jax.random.split(key)

    def ref_loss(x, y, reduction):
        l = jnp.sum(
            -y.astype(jnp.float32)
            * jax.nn.log_softmax(x.astype(jnp.float32), axis=-1),
            axis=-1,
        )
        return jnp.mean(l) if reduction == "mean" else l

    # Case 1: small f32 inputs (splits into 2 blocks so both v7x TCs are used).
    B, C = 16, 32
    x = jax.random.normal(kx, (B, C), dtype=jnp.float32)
    y = jax.nn.softmax(jax.random.normal(ky, (B, C), dtype=jnp.float32), axis=-1)

    out_mean = soft_target_cross_entropy(x, y, reduction="mean")
    out_none = soft_target_cross_entropy(x, y, reduction="none")
    jax.block_until_ready(out_mean)
    jax.block_until_ready(out_none)
    assert jnp.allclose(out_none, ref_loss(x, y, "none"), atol=1e-5, rtol=1e-5)
    assert jnp.allclose(out_mean, ref_loss(x, y, "mean"), atol=1e-5, rtol=1e-5)

    # Case 2: non-divisible batch, multi-block grid with in-kernel tail masking
    # (no jnp.pad / no extra HBM copies).
    B2, C2 = 20, 32
    x2 = jax.random.normal(kx, (B2, C2), dtype=jnp.float32)
    y2 = jax.nn.softmax(jax.random.normal(ky, (B2, C2), dtype=jnp.float32), axis=-1)
    out2 = soft_target_cross_entropy(x2, y2, reduction="none", max_block_rows=8)
    out2_mean = soft_target_cross_entropy(x2, y2, reduction="mean", max_block_rows=8)
    jax.block_until_ready(out2)
    jax.block_until_ready(out2_mean)
    assert jnp.allclose(out2, ref_loss(x2, y2, "none"), atol=1e-5, rtol=1e-5)
    assert jnp.allclose(out2_mean, ref_loss(x2, y2, "mean"), atol=1e-5, rtol=1e-5)

    # Case 3: bf16 inputs streamed as-is (half the HBM traffic), f32 math
    # in-kernel, f32 'mean' result.
    xb = x.astype(jnp.bfloat16)
    yb = y.astype(jnp.bfloat16)
    outb = soft_target_cross_entropy(xb, yb, reduction="mean")
    jax.block_until_ready(outb)
    assert jnp.allclose(
        outb.astype(jnp.float32), ref_loss(xb, yb, "mean"), atol=2e-2, rtol=2e-2
    )

    print("KERNEL_OK")
</pallas_src>

<mosaic_0001>
module attributes {stable_mosaic.version = 11 : i64} {
  func.func @_soft_xent_kernel(%arg0: i32, %arg1: memref<8x32xf32, #tpu.memory_space<vmem>>, %arg2: memref<8x32xf32, #tpu.memory_space<vmem>>, %arg3: memref<8x1xf32, #tpu.memory_space<vmem>>) attributes {dimension_semantics = [#tpu.dimension_semantics<parallel>], iteration_bounds = array<i64: 2>, scalar_prefetch = 0 : i64, scratch_operands = 0 : i64, tpu.core_type = #tpu.core_type<tc>, window_params = [{transform_indices = @transform_0, window_bounds = array<i64: 8, 32>}, {transform_indices = @transform_1, window_bounds = array<i64: 8, 32>}, {transform_indices = @transform_2, window_bounds = array<i64: 8, 1>}]} {
    %c0 = arith.constant 0 : index
    %c0_0 = arith.constant 0 : index
    %0 = vector.load %arg1[%c0, %c0_0] : memref<8x32xf32, #tpu.memory_space<vmem>>, vector<8x32xf32>
    %c0_1 = arith.constant 0 : index
    %c0_2 = arith.constant 0 : index
    %1 = vector.load %arg2[%c0_1, %c0_2] : memref<8x32xf32, #tpu.memory_space<vmem>>, vector<8x32xf32>
    %cst = arith.constant dense<0xFF800000> : vector<8xf32>
    %2 = vector.multi_reduction <maximumf>, %0, %cst [1] : vector<8x32xf32> to vector<8xf32>
    %3 = vector.shape_cast %2 : vector<8xf32> to vector<8x1xf32>
    %4 = vector.broadcast %3 : vector<8x1xf32> to vector<8x32xf32>
    %5 = arith.subf %0, %4 : vector<8x32xf32>
    %6 = math.exp %5 : vector<8x32xf32>
    %cst_3 = arith.constant dense<0.000000e+00> : vector<8xf32>
    %7 = vector.multi_reduction <add>, %6, %cst_3 [1] : vector<8x32xf32> to vector<8xf32>
    %8 = vector.shape_cast %7 : vector<8xf32> to vector<8x1xf32>
    %9 = math.log %8 : vector<8x1xf32>
    %10 = arith.addf %3, %9 : vector<8x1xf32>
    %cst_4 = arith.constant dense<0.000000e+00> : vector<8xf32>
    %11 = vector.multi_reduction <add>, %1, %cst_4 [1] : vector<8x32xf32> to vector<8xf32>
    %12 = vector.shape_cast %11 : vector<8xf32> to vector<8x1xf32>
    %13 = arith.mulf %1, %0 : vector<8x32xf32>
    %cst_5 = arith.constant dense<0.000000e+00> : vector<8xf32>
    %14 = vector.multi_reduction <add>, %13, %cst_5 [1] : vector<8x32xf32> to vector<8xf32>
    %15 = vector.shape_cast %14 : vector<8xf32> to vector<8x1xf32>
    %16 = arith.mulf %10, %12 : vector<8x1xf32>
    %17 = arith.subf %16, %15 : vector<8x1xf32>
    %c8_i32 = arith.constant 8 : i32
    %18 = arith.muli %arg0, %c8_i32 : i32
    %19 = tpu.iota {dimensions = array<i32: 0>} : vector<8x1xi32>
    %20 = vector.broadcast %18 : i32 to vector<8x1xi32>
    %21 = arith.addi %20, %19 : vector<8x1xi32>
    %c16_i32 = arith.constant 16 : i32
    %22 = vector.broadcast %c16_i32 : i32 to vector<8x1xi32>
    %23 = arith.cmpi slt, %21, %22 : vector<8x1xi32>
    %cst_6 = arith.constant 0.000000e+00 : f32
    %24 = vector.broadcast %cst_6 : f32 to vector<8x1xf32>
    %25 = arith.select %23, %17, %24 : vector<8x1xi1>, vector<8x1xf32>
    %c0_7 = arith.constant 0 : index
    %c0_8 = arith.constant 0 : index
    %26 = vector.load %arg3[%c0_7, %c0_8] : memref<8x1xf32, #tpu.memory_space<vmem>>, vector<8x1xf32>
    tpu.vector_store %arg3[%c0_7, %c0_8], %25 {strides = array<i32>} : memref<8x1xf32, #tpu.memory_space<vmem>>, vector<8x1xf32>,
    return
  }
  func.func @transform_0(%arg0: i32) -> (i32, i32) {
    %c0_i32 = arith.constant 0 : i32
    %c0_i32_0 = arith.constant 0 : i32
    return %arg0, %c0_i32 : i32, i32
  }
  func.func @transform_1(%arg0: i32) -> (i32, i32) {
    %c0_i32 = arith.constant 0 : i32
    %c0_i32_0 = arith.constant 0 : i32
    return %arg0, %c0_i32 : i32, i32
  }
  func.func @transform_2(%arg0: i32) -> (i32, i32) {
    %c0_i32 = arith.constant 0 : i32
    %c0_i32_0 = arith.constant 0 : i32
    return %arg0, %c0_i32 : i32, i32
  }
}

</mosaic_0001>

<bundles_post_ra>
// kernel: tpu_custom_call.1
= control target key start
LH: loop header
LB: loop body
LE: loop exit
PB: predicated region body
PF: predicated region fallthrough
CT: control target
= control target key end

     0   :  { %7 = vsyncpa [#allocation3], 0  ;;  %s651_s0 = inlined_call_operand.hbm [shape: f32[16,32], index: 0, kind: input, shape index: {}]   ;;  %s652_s1 = inlined_call_operand.hbm [shape: f32[16,32], index: 1, kind: input, shape index: {}]   ;;  %s653_s2 = inlined_call_operand.vmem [shape: f32[16,1], index: 2, kind: output, shape index: {}]  }
   0x1   :  { %9 = vsyncpa [#allocation3 + $0x1], 0 }
   0x2   :  { %10 = vsyncpa [#allocation5], 0 }
   0x3   :  { %12 = vsyncpa [#allocation5 + $0x1], 0  ;;  %s496_s9 = smov 0   ;;  %s498_s10 = smov 0  }
   0x4   :  { %s500_s11 = smov 0   ;;  %s502_s12 = smov 0  }
   0x5 LB: > { %s515_s13 = sadd.s32 4294967295, %s477_s12   ;;  %s518_s14 = sadd.s32 1, %s477_s12   ;;  %s477_s12 = sphi %s502_s12, %s665_s12   ;;  %s473_s11 = sphi %s500_s11, %s664_s11   ;;  %s469_s10 = sphi %s498_s10, %s663_s10   ;;  %s465_s9 = sphi %s496_s9, %s662_s9  }
   0x6   : > { %s22_s15 = ssub.s32 %s477_s12, %s518_s14  ;;  %s25_s16 = sadd.s32 1, %s473_s11 }
   0x7   : > { %p23_p0 = scmp.eq.s32.totalorder %s22_s15, 0  ;;  %p32_p1 = scmp.ne.s32.totalorder %s473_s11, %s469_s10 }
   0x8   : > { %p33_p2 = scmp.eq.s32.totalorder %s477_s12, 0  ;;  %p38_p3 = scmp.ne.s32.totalorder %s469_s10, %s465_s9 }
   0x9   : > { %s528_s17 = scalar_select %p23_p0, %s473_s11, %s25_s16  }
   0xa   : > { %p34_p4 = por %p33_p2, %p32_p1  ;;  %p39_p5 = scmp.eq.s32.totalorder %s515_s13, 0 }
   0xb   : > { %p342_p6 = scmp.lt.s32.totalorder %s477_s12, 2  ;;  %s537_s19 = sand.u32 1, %s473_s11  }
   0xc   : > { %p532_p7 = por %p39_p5, %p38_p3  ;;  %s320_s20 = sshll.u32 %s537_s19, 3 }
   0xd   : > { %s321_s21 = sshll.u32 %s477_s12, 7  ;;  %s118_s25 = scalar_lea.vmem [#allocation2], %s320_s20 }
   0xe   : > { %s655_s18 = scalar_select %p532_p7, 1, 0 }
   0xf   : > { %s546_s24 = scalar_lea.hbm %s651_s0, %s321_s21  ;;  %s125_s26 = sshll.u32 %s118_s25, 4  ;;  %s550_s26 = int_to_ptr.vmem [resolvable:$true] %s125_s26 }
  0x10   : > { %p552_p8 = pnand %p342_p6, %p34_p4  ;;  %s115_s28 = scalar_lea.sflag [#allocation3], %s537_s19 }
  0x11   : > { %s379_s29 = scalar_lea.hbm %s546_s24, 128  ;;  %s384_s4 = scalar_lea.hbm %s651_s0, 256 }
  0x12   : > { %p380_p11 = scmp.ne.s32.totalorder %s546_s24, %s379_s29  ;;  %p381_p12 = pneg %p552_p8 }
  0x13   : > { %p385_p1 = scmp.lt.u32.totalorder %s546_s24, %s651_s0  ;;  %p386_p2 = scmp.lt.u32.totalorder %s384_s4, %s379_s29 }
  0x14   : > { %p382_p13 = pnand %p381_p12, %p380_p11  ;;  %p388_p4 = scmp.lt.u32.totalorder %s379_s29, %s546_s24 }
  0x15   : > { %p387_p3 = por %p386_p2, %p385_p1 }
  0x16   : > { %p383_p0 = pneg %p382_p13 }
  0x17   : > { %p389_p5 = por %p388_p4, %p387_p3 }
  0x19   : > { %p390_p6 = pnand %p389_p5, %p383_p0 }
  0x1b   : > { %393 = shalt.err (!%p390_p6)
}
  0x1c   : > { %s394_s7 = scalar_lea.vmem %s550_s26, 128  ;;  %s479_s8 = smov [#allocation2]  }
  0x1d   : > { %p395_p11 = scmp.ne.s32.totalorder %s550_s26, %s394_s7  ;;  %s399_s9 = sshll.u32 %s479_s8, 4  ;;  %s400_s9 = int_to_ptr.vmem [resolvable:$false] %s399_s9 }
  0x1e   : > { %s401_s15 = scalar_lea.vmem %s400_s9, 256  ;;  %p402_p10 = scmp.lt.s32.totalorder %s550_s26, %s400_s9 }
  0x1f   : > { %p397_p13 = pnand %p395_p11, %p381_p12  ;;  %p403_p1 = scmp.lt.s32.totalorder %s401_s15, %s394_s7 }
  0x21   : > { %p398_p9 = pneg %p397_p13  ;;  %p404_p2 = por %p403_p1, %p402_p10 }
  0x23   : > { %p405_p3 = pnand %p404_p2, %p398_p9 }
  0x25   : > { %408 = shalt.err (!%p405_p3)
}
  0x26   : > { %338 = dma.hbm_to_vmem [thread:$0]  (!%p552_p8), %s546_s24, 128, %s550_s26, %s115_s28  }
  0x27   : > { %p657_p0 = scmp.lt.s32.totalorder %s477_s12, 3  ;;  %p658_p4 = scmp.ge.s32.totalorder %s477_s12, 1 }
  0x28   : > { %s597_s25 = scalar_lea.hbm %s652_s1, %s321_s21  ;;  %s136_s29 = scalar_lea.vmem [#allocation4], %s320_s20 }
  0x29   : > { %p588_p5 = pnand %p658_p4, %p657_p0  ;;  %s143_s30 = sshll.u32 %s136_s29, 4  ;;  %s144_s30 = int_to_ptr.vmem [resolvable:$true] %s143_s30 }
  0x2a   : > { %s133_s24 = scalar_lea.sflag [#allocation5], %s537_s19  ;;  %s409_s26 = scalar_lea.hbm %s597_s25, 128 }
  0x2b   : > { %s659_s16 = scalar_select %p588_p5, 1, 0 }
  0x2c   : > { %p410_p9 = scmp.ne.s32.totalorder %s597_s25, %s409_s26  ;;  %s414_s21 = scalar_lea.hbm %s652_s1, 256 }
  0x2d   : > { %p415_p11 = scmp.lt.u32.totalorder %s597_s25, %s652_s1  ;;  %p416_p13 = scmp.lt.u32.totalorder %s414_s21, %s409_s26 }
  0x2e   : > { %p412_p10 = pnand %p410_p9, %p381_p12  ;;  %p418_p2 = scmp.lt.u32.totalorder %s409_s26, %s597_s25 }
  0x2f   : > { %p417_p1 = por %p416_p13, %p415_p11 }
  0x30   : > { %p413_p6 = pneg %p412_p10 }
  0x31   : > { %p419_p3 = por %p418_p2, %p417_p1 }
  0x33   : > { %p420_p0 = pnand %p419_p3, %p413_p6 }
  0x35   : > { %423 = shalt.err (!%p420_p0)
}
  0x36   : > { %s424_s19 = scalar_lea.vmem %s144_s30, 128  ;;  %s480_s20 = smov [#allocation4]  }
  0x37   : > { %p425_p4 = scmp.ne.s32.totalorder %s144_s30, %s424_s19  ;;  %s429_s5 = sshll.u32 %s480_s20, 4  ;;  %s430_s5 = int_to_ptr.vmem [resolvable:$false] %s429_s5 }
  0x38   : > { %s431_s6 = scalar_lea.vmem %s430_s5, 256  ;;  %p432_p7 = scmp.lt.s32.totalorder %s144_s30, %s430_s5 }
  0x39   : > { %p427_p9 = pnand %p425_p4, %p381_p12  ;;  %p433_p5 = scmp.lt.s32.totalorder %s431_s6, %s424_s19 }
  0x3b   : > { %p428_p10 = pneg %p427_p9  ;;  %p434_p11 = por %p433_p5, %p432_p7 }
  0x3d   : > { %p435_p13 = pnand %p434_p11, %p428_p10 }
  0x3f   : > { %438 = shalt.err (!%p435_p13)
}
  0x40   : > { %341 = dma.hbm_to_vmem [thread:$0]  (!%p552_p8), %s597_s25, 128, %s144_s30, %s133_s24  }
  0x41   : > { %p660_p6 = scmp.ne.s32.totalorder %s659_s16, 0 }
  0x42   : > { %s154_s7 = sand.u32 (!%p660_p6), 1, %s469_s10   ;;  %p661_p12 = scmp.ne.s32.totalorder (!%p660_p6), %s655_s18, 0 }
  0x43   : > { %152 = sbr.rel (%p660_p6) target bundleno = 400 (0x190), region = 28  ;;  %s325_s8 = sshll.u32 (!%p660_p6), %s154_s7, 3 }
  0x44   : > { %s155_s9 = scalar_lea.sflag (!%p660_p6), [#allocation3], %s154_s7  ;;  %s158_s15 = scalar_lea.vmem (!%p660_p6), [#allocation2], %s325_s8 }
  0x4a   : > { %456 = dma.done.wait (%p661_p12), %s155_s9, 128  }
  0x4b   : > { %458 = vsyncadd (%p661_p12), %s155_s9, 4294967168  ;;  %s164_s22 = scalar_lea.sflag [#allocation5], %s154_s7  ;;  %s167_s23 = scalar_lea.vmem [#allocation4], %s325_s8 }
  0x4c   : > { %460 = dma.done.wait (%p661_p12), %s164_s22, 128  }
  0x4d   : > { %462 = vsyncadd (%p661_p12), %s164_s22, 4294967168  ;;  %vm198_vm0 = vcmask 261120   ;;  %v196_v0 = vld [vmem:[%s158_s15] sm:$0xff]  ;;  %v197_v2 = vld [vmem:[%s167_s23] sm:$0xff]  ;;  %v221_v12 = vlaneseq  ;;  %p192_p7 = scmp.lt.s32.totalorder %s515_s13, 1  ;;  %s328_s18 = sshll.u32 %s515_s13, 3 }
  0x4e   : > { %v199_v1 = vsel %vm198_vm0, %v196_v0, -inf  ;;  %v211_v3 = vsel %vm198_vm0, %v197_v2, 0.0  ;;  %v214_v4 = vmul.f32 %v197_v2, %v196_v0  ;;  %v223_v15 = vstv %s328_s18 }
  0x4f   : > { %200 = vmax.xlane.f32.xlu0 %v199_v1  ;;  %212 = vadd.xlane.f32.xlu1 %v211_v3  ;;  %v222_v14 = vshrl.u32 %v221_v12, 7  ;;  %s667_s13 = smov (!%p192_p7, %s515_s13), 1  ;;  %vm227_vm2 = vcmask 7168  }
  0x50   : > { %v215_v5 = vsel %vm198_vm0, %v214_v4, 0.0  ;;  %s327_s27 = sshll.u32 %s667_s13, 3 }
  0x51   : > { %v224_v18 = vadd.s32 %v223_v15, %v222_v14  ;;  %s195_s29 = scalar_lea.vmem %s653_s2, %s327_s27 }
  0x53   : > { %216 = vadd.xlane.f32.xlu1 %v215_v5  ;;  %vm225_vm1 = vcmp.lt.s32.totalorder %v224_v18, 16 }
  0xdc   : > { %v201_v6 = vpop.xlane.xlu0 %200  ;;  %v213_v13 = vpop.xlane.xlu1 %212 }
  0xdd   : > { %v202_v7 = vsub.f32 %v196_v0, %v201_v6 }
  0xdf   : > { %v203_v8 = vmul.f32 1.442695, %v202_v7 }
  0xe0   : > { %v217_v20 = vpop.xlane.xlu1 %216 }
  0xe1   : > { %375 = vpow2.f32 %v203_v8 }
  0xeb   : > { %v376_v9 = vpop.eup %375 }
  0xec   : > { %v205_v10 = vsel %vm198_vm0, %v376_v9, 0.0 }
  0xed   : > { %206 = vadd.xlane.f32.xlu0 %v205_v10 }
 0x17a   : > { %v207_v11 = vpop.xlane.xlu0 %206 }
 0x17b   : > { %377 = vlog2.f32 %v207_v11 }
 0x185   : > { %v378_v16 = vpop.eup %377 }
 0x186   : > { %v209_v17 = vmul.f32 0.6931472, %v378_v16 }
 0x188   : > { %v210_v19 = vadd.f32 %v209_v17, %v201_v6 }
 0x18a   : > { %v218_v21 = vmul.f32 %v213_v13, %v210_v19 }
 0x18c   : > { %v219_v22 = vsub.f32 %v218_v21, %v217_v20 }
 0x18e   : > { %v226_v23 = vsel %vm225_vm1, %v219_v22, 0.0 }
 0x18f   : > { %228 = vst.msk [vmem:[%s195_s29] sm:$0xff] %vm227_vm2, %v226_v23 }
 0x190 PF: > { %p15_p8 = scmp.ge.s32.totalorder %s518_s14, 4   ;;  %s662_s9 = smov %s469_s10 }
 0x191   : > { %s663_s10 = smov %s473_s11  ;;  %s664_s11 = smov %s528_s17 }
 0x192   : > { %s665_s12 = smov %s518_s14  ;;  %17 = sbr.rel (!%p15_p8) target bundleno = 5 (0x5), region = 81 }
 0x199   :  { %248 = vsyncpa [#allocation3], 1 }
 0x19a   :  { %250 = vsyncpa [#allocation3 + $0x1], 1 }
 0x19b   :  { %251 = vsyncpa [#allocation5], 1 }
 0x19c   :  { %253 = vsyncpa [#allocation5 + $0x1], 1 }

</bundles_post_ra>
